<compile_context>
chip_gen: v5e
topology: v5e:2x2
jax: 0.10.0
libtpu: 0.0.40
codegen_flags: <defaults>
</compile_context>

<pallas_src>
import functools

import jax
import jax.numpy as jnp
from jax import lax
from jax.experimental import pallas as pl
from jax.experimental.pallas import tpu as pltpu

EPS = 1e-5  # nn.BatchNorm1d default eps


def _cdiv(a, b):
    return -(-a // b)


def _round_up(a, b):
    return _cdiv(a, b) * b


def _vmem_limit_bytes():
    """Generation-aware scoped-VMEM limit: ~3/4 of physical per-TC VMEM."""
    cap = None
    try:
        cap = getattr(pltpu.get_tpu_info(), "vmem_capacity_bytes", None)
    except Exception:
        cap = None
    if not cap:
        cap = 64 * 1024 * 1024  # conservative fallback (v7x per-TC VMEM)
    # 128 MiB (v5e/v6e) -> 96 MiB; 64 MiB (v7x) -> 48 MiB; cap at 110 MiB.
    return int(min((cap * 3) // 4, 110 * 1024 * 1024))


def _choose_f_tile(B, F, T_pad, dtype, vmem_limit, *, min_tiles=4):
    """Largest dtype-granular F tile whose full VMEM footprint fits the limit."""
    itemsize = jnp.dtype(dtype).itemsize
    gran = max(8, 32 // itemsize)  # sublane packing: 8 f32, 16 bf16, 32 int8/fp8
    # Per-channel footprint of one grid step:
    #   2x double-buffered input + 2x double-buffered output (native dtype)
    #   + in-kernel f32 copy of x + f32 centered diff + one f32 temp of slack.
    per_channel = B * T_pad * (4 * itemsize + 12)
    budget = max(vmem_limit - (8 << 20), vmem_limit // 2)  # headroom for scratch/sems
    by_budget = max((budget // per_channel) // gran * gran, gran)
    # Keep >= min_tiles grid steps when F allows: prefetch/writeback overlap and
    # a clean split across the two TensorCores on v7x.
    by_split = max(_round_up(_cdiv(F, min_tiles), gran), gran)
    f_cap = _round_up(F, gran)
    # TODO(synk): if even `gran` channels exceed the budget (huge B*T, notably on
    # v7x's 64 MiB VMEM), fall back to a two-pass T-tiled stats/apply variant.
    return int(min(by_budget, by_split, f_cap))


def _cbn_kernel(x_ref, c_ref, wg_ref, wb_ref, o_ref, *, n_valid, t_valid):
    # x_ref/o_ref: (B, Ft, Tp)   c_ref: (B, C+1)   wg/wb_ref: (Ft, C+1)
    x = x_ref[...].astype(jnp.float32)
    B, Ft, Tp = x.shape

    if t_valid != Tp:
        # T was padded to a lane-dense multiple of 128; mask padded lanes out of the stats.
        lane = lax.broadcasted_iota(jnp.int32, (B, Ft, Tp), 2)
        valid = lane < t_valid
        xs = jnp.where(valid, x, 0.0)
    else:
        valid = None
        xs = x

    # --- per-channel batch statistics: two-pass (centered), biased variance ---
    inv_n = 1.0 / float(n_valid)
    mean = jnp.sum(xs, axis=(0, 2), keepdims=True) * inv_n        # (1, Ft, 1)
    diff = xs - mean
    if valid is not None:
        diff = jnp.where(valid, diff, 0.0)
    var = jnp.sum(diff * diff, axis=(0, 2), keepdims=True) * inv_n
    rstd = lax.rsqrt(var + EPS)                                   # (1, Ft, 1)

    # --- 1x1 Conv1d == c_aug @ W_aug.T (bias folded); tiny K = C+1, lane-dense on Ft ---
    c = c_ref[...].astype(jnp.float32)                            # (B, C+1)
    dims = (((1,), (1,)), ((), ()))                               # trans-B contraction
    gamma = lax.dot_general(c, wg_ref[...].astype(jnp.float32), dims,
                            preferred_element_type=jnp.float32)   # (B, Ft)
    beta = lax.dot_general(c, wb_ref[...].astype(jnp.float32), dims,
                           preferred_element_type=jnp.float32)    # (B, Ft)

    # --- fused apply: out = x * s + t  (2 VALU ops / element, no full-size temp) ---
    s = gamma[:, :, None] * rstd                                  # (B, Ft, 1)
    t = beta[:, :, None] - mean * s                               # (B, Ft, 1)
    o_ref[...] = (x * s + t).astype(o_ref.dtype)


def cbatchnorm1d(x, c, wg, bg, wb, bb, *, f_tile=None):
    """x: (B, F, T); c: (B, C) or (B, C, 1); wg/wb: (F, C); bg/bb: (F,)."""
    assert x.shape[0] == c.shape[0]
    if c.ndim == 3:                      # mirrors the `c.unsqueeze(2)` handling
        c = c[:, :, 0]
    B, F, T = x.shape
    C = c.shape[1]
    assert wg.shape == (F, C) and wb.shape == (F, C)
    assert bg.shape == (F,) and bb.shape == (F,)

    # Fold conv biases into an augmented weight column: gamma = [c, 1] @ [Wg | bg].T
    ones = jnp.ones((B, 1), dtype=c.dtype)
    c_aug = jnp.concatenate([c, ones], axis=1)                    # (B, C+1)
    wg_aug = jnp.concatenate([wg, bg.reshape(F, 1)], axis=1)      # (F, C+1)
    wb_aug = jnp.concatenate([wb, bb.reshape(F, 1)], axis=1)      # (F, C+1)

    # Lane-dense T: pad to a multiple of 128 (stats mask the pad; output sliced).
    T_pad = _round_up(T, 128)
    x_in = x if T_pad == T else jnp.pad(x, ((0, 0), (0, 0), (0, T_pad - T)))

    vmem_limit = _vmem_limit_bytes()
    if f_tile is None:
        f_tile = _choose_f_tile(B, F, T_pad, x.dtype, vmem_limit)
    n_tiles = _cdiv(F, f_tile)            # cdiv grid: partial last tile is masked

    kernel = functools.partial(_cbn_kernel, n_valid=B * T, t_valid=T)

    out = pl.pallas_call(
        kernel,
        out_shape=jax.ShapeDtypeStruct((B, F, T_pad), x.dtype),
        grid=(n_tiles,),
        in_specs=[
            pl.BlockSpec((B, f_tile, T_pad), lambda i: (0, i, 0)),   # x tile over F
            pl.BlockSpec((B, C + 1), lambda i: (0, 0)),              # c (full, small)
            pl.BlockSpec((f_tile, C + 1), lambda i: (i, 0)),         # gamma weights
            pl.BlockSpec((f_tile, C + 1), lambda i: (i, 0)),         # beta weights
        ],
        out_specs=pl.BlockSpec((B, f_tile, T_pad), lambda i: (0, i, 0)),
        # TODO(synk): on v7x, sweep pipeline_mode=pl.Buffered(3) on the x spec if
        # the DMA is still exposed in the trace after the larger blocks.
        compiler_params=pltpu.CompilerParams(
            dimension_semantics=("parallel",),
            vmem_limit_bytes=vmem_limit,
        ),
    )(x_in, c_aug, wg_aug, wb_aug)

    return out if T_pad == T else out[:, :, :T]


def cbatchnorm1d_ref(x, c, wg, bg, wb, bb):
    """Pure-JAX reference (PyTorch semantics)."""
    if c.ndim == 3:
        c = c[:, :, 0]
    gamma = jnp.einsum('fc,bc->bf', wg, c) + bg          # (B, F)
    beta = jnp.einsum('fc,bc->bf', wb, c) + bb           # (B, F)
    mean = jnp.mean(x, axis=(0, 2), keepdims=True)
    var = jnp.mean((x - mean) ** 2, axis=(0, 2), keepdims=True)
    net = (x - mean) / jnp.sqrt(var + EPS)
    return gamma[:, :, None] * net + beta[:, :, None]


def _make_inputs(key, B, C_DIM, F_DIM, T):
    kx, kc, k1, k2, k3, k4 = jax.random.split(key, 6)
    x = jax.random.normal(kx, (B, F_DIM, T), dtype=jnp.float32) + 0.5
    c = jax.random.normal(kc, (B, C_DIM), dtype=jnp.float32)
    # Deterministic synthetic Conv1d(c_dim, f_dim, 1) parameters.
    # (reset_parameters would give wg=wb=0, bg=1, bb=0 -> degenerate conditioning;
    #  random deterministic values exercise the matmul path.)
    wg = 0.1 * jax.random.normal(k1, (F_DIM, C_DIM), dtype=jnp.float32)
    bg = jnp.ones((F_DIM,), dtype=jnp.float32) + 0.1 * jax.random.normal(k2, (F_DIM,), dtype=jnp.float32)
    wb = 0.1 * jax.random.normal(k3, (F_DIM, C_DIM), dtype=jnp.float32)
    bb = 0.1 * jax.random.normal(k4, (F_DIM,), dtype=jnp.float32)
    return x, c, wg, bg, wb, bb


if __name__ == "__main__":
    key = jax.random.PRNGKey(0)
    k1, k2 = jax.random.split(key)

    # Case 1: aligned shapes (F divisible by tile, T multiple of 128).
    x, c, wg, bg, wb, bb = _make_inputs(k1, 2, 4, 32, 128)
    out = cbatchnorm1d(x, c, wg, bg, wb, bb)
    jax.block_until_ready(out)
    ref = cbatchnorm1d_ref(x, c, wg, bg, wb, bb)
    assert out.shape == x.shape
    assert jnp.allclose(out, ref, atol=2e-5, rtol=2e-5), "mismatch vs reference (aligned)"

    # Case 2: ragged shapes -> exercises T padding/masking and partial last F tile.
    x2, c2, wg2, bg2, wb2, bb2 = _make_inputs(k2, 2, 4, 40, 96)
    out2 = cbatchnorm1d(x2, c2, wg2, bg2, wb2, bb2)
    jax.block_until_ready(out2)
    ref2 = cbatchnorm1d_ref(x2, c2, wg2, bg2, wb2, bb2)
    assert out2.shape == x2.shape
    assert jnp.allclose(out2, ref2, atol=2e-5, rtol=2e-5), "mismatch vs reference (ragged)"

    print("KERNEL_OK")
</pallas_src>

<mosaic_0001>
module attributes {stable_mosaic.version = 11 : i64} {
  func.func @_cbn_kernel(%arg0: i32, %arg1: memref<2x8x128xf32, #tpu.memory_space<vmem>>, %arg2: memref<2x5xf32, #tpu.memory_space<vmem>>, %arg3: memref<8x5xf32, #tpu.memory_space<vmem>>, %arg4: memref<8x5xf32, #tpu.memory_space<vmem>>, %arg5: memref<2x8x128xf32, #tpu.memory_space<vmem>>) attributes {dimension_semantics = [#tpu.dimension_semantics<parallel>], iteration_bounds = array<i64: 4>, scalar_prefetch = 0 : i64, scratch_operands = 0 : i64, tpu.core_type = #tpu.core_type<tc>, window_params = [{transform_indices = @transform_0, window_bounds = array<i64: 2, 8, 128>}, {pipeline_mode = #tpu.pipeline_mode<synchronous>, transform_indices = @transform_1, window_bounds = array<i64: 2, 5>}, {transform_indices = @transform_2, window_bounds = array<i64: 8, 5>}, {transform_indices = @transform_3, window_bounds = array<i64: 8, 5>}, {transform_indices = @transform_4, window_bounds = array<i64: 2, 8, 128>}]} {
    %c0 = arith.constant 0 : index
    %c0_0 = arith.constant 0 : index
    %c0_1 = arith.constant 0 : index
    %0 = vector.load %arg1[%c0, %c0_0, %c0_1] : memref<2x8x128xf32, #tpu.memory_space<vmem>>, vector<2x8x128xf32>
    %cst = arith.constant dense<0.000000e+00> : vector<8xf32>
    %1 = vector.multi_reduction <add>, %0, %cst [0, 2] : vector<2x8x128xf32> to vector<8xf32>
    %2 = vector.shape_cast %1 : vector<8xf32> to vector<1x8x1xf32>
    %cst_2 = arith.constant 3.906250e-03 : f32
    %3 = vector.broadcast %cst_2 : f32 to vector<1x8x1xf32>
    %4 = arith.mulf %2, %3 : vector<1x8x1xf32>
    %5 = vector.broadcast %4 : vector<1x8x1xf32> to vector<2x8x128xf32>
    %6 = arith.subf %0, %5 : vector<2x8x128xf32>
    %7 = arith.mulf %6, %6 : vector<2x8x128xf32>
    %cst_3 = arith.constant dense<0.000000e+00> : vector<8xf32>
    %8 = vector.multi_reduction <add>, %7, %cst_3 [0, 2] : vector<2x8x128xf32> to vector<8xf32>
    %9 = vector.shape_cast %8 : vector<8xf32> to vector<1x8x1xf32>
    %cst_4 = arith.constant 3.906250e-03 : f32
    %10 = vector.broadcast %cst_4 : f32 to vector<1x8x1xf32>
    %11 = arith.mulf %9, %10 : vector<1x8x1xf32>
    %cst_5 = arith.constant 9.99999974E-6 : f32
    %12 = vector.broadcast %cst_5 : f32 to vector<1x8x1xf32>
    %13 = arith.addf %11, %12 : vector<1x8x1xf32>
    %14 = math.rsqrt %13 : vector<1x8x1xf32>
    %c0_6 = arith.constant 0 : index
    %c0_7 = arith.constant 0 : index
    %15 = vector.load %arg2[%c0_6, %c0_7] : memref<2x5xf32, #tpu.memory_space<vmem>>, vector<2x5xf32>
    %c0_8 = arith.constant 0 : index
    %c0_9 = arith.constant 0 : index
    %16 = vector.load %arg3[%c0_8, %c0_9] : memref<8x5xf32, #tpu.memory_space<vmem>>, vector<8x5xf32>
    %cst_10 = arith.constant dense<0.000000e+00> : vector<2x8xf32>
    %17 = tpu.matmul %15, %16, %cst_10 {dimension_numbers = #tpu.dot_dimension_numbers<[1], [1], [0], [0], [0, 0, 1, 0], [], []>} : vector<2x5xf32>, vector<8x5xf32>, vector<2x8xf32> -> vector<2x8xf32>
    %c0_11 = arith.constant 0 : index
    %c0_12 = arith.constant 0 : index
    %18 = vector.load %arg4[%c0_11, %c0_12] : memref<8x5xf32, #tpu.memory_space<vmem>>, vector<8x5xf32>
    %cst_13 = arith.constant dense<0.000000e+00> : vector<2x8xf32>
    %19 = tpu.matmul %15, %18, %cst_13 {dimension_numbers = #tpu.dot_dimension_numbers<[1], [1], [0], [0], [0, 0, 1, 0], [], []>} : vector<2x5xf32>, vector<8x5xf32>, vector<2x8xf32> -> vector<2x8xf32>
    %20 = vector.shape_cast %17 : vector<2x8xf32> to vector<2x8x1xf32>
    %21 = vector.broadcast %14 : vector<1x8x1xf32> to vector<2x8x1xf32>
    %22 = arith.mulf %20, %21 : vector<2x8x1xf32>
    %23 = vector.shape_cast %19 : vector<2x8xf32> to vector<2x8x1xf32>
    %24 = vector.broadcast %4 : vector<1x8x1xf32> to vector<2x8x1xf32>
    %25 = arith.mulf %24, %22 : vector<2x8x1xf32>
    %26 = arith.subf %23, %25 : vector<2x8x1xf32>
    %27 = vector.broadcast %22 : vector<2x8x1xf32> to vector<2x8x128xf32>
    %28 = arith.mulf %0, %27 : vector<2x8x128xf32>
    %29 = vector.broadcast %26 : vector<2x8x1xf32> to vector<2x8x128xf32>
    %30 = arith.addf %28, %29 : vector<2x8x128xf32>
    %c0_14 = arith.constant 0 : index
    %c0_15 = arith.constant 0 : index
    %c0_16 = arith.constant 0 : index
    %31 = vector.load %arg5[%c0_14, %c0_15, %c0_16] : memref<2x8x128xf32, #tpu.memory_space<vmem>>, vector<2x8x128xf32>
    tpu.vector_store %arg5[%c0_14, %c0_15, %c0_16], %30 {strides = array<i32>} : memref<2x8x128xf32, #tpu.memory_space<vmem>>, vector<2x8x128xf32>,
    return
  }
  func.func @transform_0(%arg0: i32) -> (i32, i32, i32) {
    %c0_i32 = arith.constant 0 : i32
    %c0_i32_0 = arith.constant 0 : i32
    %c0_i32_1 = arith.constant 0 : i32
    return %c0_i32, %arg0, %c0_i32_0 : i32, i32, i32
  }
  func.func @transform_1(%arg0: i32) -> (i32, i32) {
    %c0_i32 = arith.constant 0 : i32
    %c0_i32_0 = arith.constant 0 : i32
    %c0_i32_1 = arith.constant 0 : i32
    return %c0_i32, %c0_i32_0 : i32, i32
  }
  func.func @transform_2(%arg0: i32) -> (i32, i32) {
    %c0_i32 = arith.constant 0 : i32
    %c0_i32_0 = arith.constant 0 : i32
    return %arg0, %c0_i32 : i32, i32
  }
  func.func @transform_3(%arg0: i32) -> (i32, i32) {
    %c0_i32 = arith.constant 0 : i32
    %c0_i32_0 = arith.constant 0 : i32
    return %arg0, %c0_i32 : i32, i32
  }
  func.func @transform_4(%arg0: i32) -> (i32, i32, i32) {
    %c0_i32 = arith.constant 0 : i32
    %c0_i32_0 = arith.constant 0 : i32
    %c0_i32_1 = arith.constant 0 : i32
    return %c0_i32, %arg0, %c0_i32_0 : i32, i32, i32
  }
}

</mosaic_0001>

<bundles_post_ra>
// kernel: tpu_custom_call.1
= control target key start
LH: loop header
LB: loop body
LE: loop exit
PB: predicated region body
PF: predicated region fallthrough
CT: control target
= control target key end

     0   :  { %9 = vsyncpa [#allocation4], 0  ;;  %s767_s0 = inlined_call_operand.vmem [shape: f32[2,32,128], index: 0, kind: input, shape index: {}]   ;;  %s768_s1 = inlined_call_operand.vmem [shape: f32[2,5], index: 1, kind: input, shape index: {}]   ;;  %s769_s2 = inlined_call_operand.vmem [shape: f32[32,5], index: 2, kind: input, shape index: {}]   ;;  %s770_s3 = inlined_call_operand.vmem [shape: f32[32,5], index: 3, kind: input, shape index: {}]   ;;  %s771_s4 = inlined_call_operand.hbm [shape: f32[2,32,128], index: 4, kind: output, shape index: {}]  }
   0x1   :  { %11 = vsyncpa [#allocation4 + $0x1], 0  ;;  %s651_s15 = smov 0   ;;  %s653_s16 = smov 0  }
   0x2   :  { %s655_s17 = smov 0   ;;  %s657_s18 = smov 0  }
   0x3 LB: > { %s672_s19 = sadd.s32 4294967295, %s621_s18   ;;  %s494_s20 = sadd.s32 4294967294, %s621_s18   ;;  %s621_s18 = sphi %s657_s18, %s777_s18   ;;  %s617_s17 = sphi %s655_s17, %s776_s17   ;;  %s613_s16 = sphi %s653_s16, %s775_s16   ;;  %s609_s15 = sphi %s651_s15, %s774_s15  }
   0x4   : > { %s676_s21 = sadd.s32 1, %s621_s18   ;;  %s24_s22 = sadd.s32 1, %s617_s17 }
   0x5   : > { %s21_s23 = ssub.s32 %s621_s18, %s676_s21  ;;  %p31_p0 = scmp.ne.s32.totalorder %s617_s17, %s613_s16 }
   0x6   : > { %p22_p1 = scmp.eq.s32.totalorder %s21_s23, 0  ;;  %p32_p2 = scmp.eq.s32.totalorder %s621_s18, 0 }
   0x7   : > { %p134_p3 = scmp.eq.s32.totalorder %s672_s19, 3  ;;  %p139_p4 = scmp.ne.s32.totalorder %s613_s16, %s609_s15 }
   0x8   : > { %s688_s24 = scalar_select %p22_p1, %s617_s17, %s24_s22  }
   0x9   : > { %p33_p5 = por %p32_p2, %p31_p0  ;;  %p690_p6 = por %p134_p3, %p31_p0 }
   0xa   : > { %p140_p7 = scmp.eq.s32.totalorder %s494_s20, 3  ;;  %p496_p9 = scmp.ge.s32.totalorder %s621_s18, 4 }
   0xc   : > { %p694_p8 = por %p140_p7, %p139_p4  ;;  %159 = sbr.rel (%p496_p9) target bundleno = 23 (0x17), region = 20 }
  0x11   : > { %162 = sbr.rel (!%p33_p5) target bundleno = 23 (0x17), region = 24  ;;  %s164_s27 = sand.u32 (%p33_p5), 1, %s617_s17  }
  0x12   : > { %s498_s28 = sshll.u32 (%p33_p5), %s621_s18, 3  ;;  %s497_s29 = sshll.u32 (%p33_p5), %s164_s27, 4 }
  0x13   : > { %s168_s6 = scalar_lea.vmem (%p33_p5), %s767_s0, %s498_s28  ;;  %s166_s7 = scalar_lea.vmem (%p33_p5), [#allocation2], %s497_s29 }
  0x14   : > { %v199_v0 = vld [vmem:[%s168_s6] sm:$0xff] (%p33_p5) }
  0x15   : > { %v201_v1 = vld [vmem:[%s168_s6 + $0x20] sm:$0xff] (%p33_p5)  ;;  %200 = vst [vmem:[%s166_s7] sm:$0xff] (%p33_p5), %v199_v0 }
  0x16   : > { %202 = vst [vmem:[%s166_s7 + $0x8] sm:$0xff] %v201_v1 }
  0x17 PF: > { %p499_p10 = scmp.ge.s32.totalorder %s621_s18, 1  ;;  %p221_p11 = scmp.lt.s32.totalorder %s621_s18, 5 }
  0x19   : > { %p222_p12 = pnand %p499_p10, %p221_p11 }
  0x1a   : > { %s228_s8 = sand.u32 (!%p222_p12), 1, %s613_s16   ;;  %p261_p13 = scmp.lt.s32.totalorder (!%p222_p12), %s672_s19, 3 }
  0x1b   : > { %225 = sbr.rel (%p222_p12) target bundleno = 311 (0x137), region = 70  ;;  %s709_s9 = sshll.u32 (!%p222_p12), %s228_s8, 4 }
  0x1c   : > { %s230_s10 = scalar_lea.vmem (!%p222_p12), [#allocation2], %s709_s9  ;;  %s509_s30 = sshll.u32 (!%p222_p12), %s672_s19, 3 }
  0x1d   : > { %s398_s7 = scalar_lea.hbm (!%p222_p12), %s771_s4, %s509_s30  ;;  %s579_s22 = scalar_lea.hbm (!%p222_p12), %s771_s4, 64 }
  0x20   : > { %v713_v2 = vld [vmem:[%s230_s10] sm:$0xff]  ;;  %v715_v3 = vld [vmem:[%s230_s10 + $0x8] sm:$0xff]  ;;  %s262_s11 = scalar_select %p261_p13, %s672_s19, 3  ;;  %vm296_vm0 = vcmask 39936   ;;  %v348_v8 = vlaneseq }
  0x21   : > { %v271_v4 = vadd.f32 %v715_v3, %v713_v2  ;;  %v294_v7 = vld [vmem:[%s768_s1] sm:$0x3]  ;;  %s260_s10 = scalar_lea.vmem [#allocation3], %s709_s9  ;;  %s401_s19 = sshll.u32 %s398_s7, 4  ;;  %s402_s19 = int_to_ptr.hbm [resolvable:$true] %s401_s19 }
  0x22   : > { %s502_s12 = sshll.u32 %s262_s11, 3  ;;  %v349_v9 = vshrl.u32 %v348_v8, 7  ;;  %s399_s11 = sshll.u32 %s260_s10, 4  ;;  %s400_s11 = int_to_ptr.vmem [resolvable:$true] %s399_s11 }
  0x23   : > { %272 = vadd.xlane.f32.xlu0 %v271_v4  ;;  %s264_s20 = scalar_lea.vmem %s769_s2, %s502_s12  ;;  %s268_s27 = scalar_lea.vmem %s770_s3, %s502_s12 }
  0x24   : > { %v295_v5 = vld [vmem:[%s264_s20] sm:$0xff]  ;;  %554 = vset.pattern.permute.xlu1 %v349_v9  ;;  %555 = vset.pattern.permute.xlu2 %v349_v9  ;;  %s388_s9 = scalar_lea.sflag [#allocation4], %s228_s8  ;;  %s573_s12 = sshra.s32 %s402_s19, 4  ;;  %s574_s12 = int_to_ptr.hbm [resolvable:$true] %s573_s12 }
  0x25   : > { %v323_v6 = vld [vmem:[%s268_s27] sm:$0xff]  ;;  %504 = vmatpush.xpose.msk.msra.mxu0 %vm296_vm0, %v295_v5  ;;  %556 = vset.pattern.permute.xlu0 %v349_v9  ;;  %s575_s13 = scalar_lea.hbm %s574_s12, 16  ;;  %p580_p3 = scmp.lt.s32.totalorder %s574_s12, %s771_s4 }
  0x26   : > { %506 = vmatpush.xpose.msk.msra.mxu1 %vm296_vm0, %v323_v6  ;;  %p576_p0 = scmp.ne.s32.totalorder %s574_s12, %s575_s13  ;;  %p581_p4 = scmp.lt.s32.totalorder %s579_s22, %s575_s13 }
  0x28   : > { %505 = vmatmul.msk.f32.vlgmr.msra.gmra.mxu0 %vm296_vm0, %v294_v7  ;;  %p577_p1 = pnand %p576_p0, %p690_p6  ;;  %p582_p5 = por %p581_p4, %p580_p3 }
  0x29   : > { %507 = vmatmul.msk.f32.vlgmr.msra.gmra.mxu1 %vm296_vm0, %v294_v7 }
  0x2a   : > { %p578_p2 = pneg %p577_p1 }
  0x2c   : > { %p583_p7 = pnand %p582_p5, %p578_p2 }
  0x96   : > { %v273_v10 = vpop.xlane.xlu0 %272 }
  0x97   : > { %v274_v11 = vmul.f32 0.00390625, %v273_v10 }
  0x99   : > { %v275_v12 = vsub.f32 %v713_v2, %v274_v11  ;;  %v276_v13 = vsub.f32 %v715_v3, %v274_v11 }
  0x9b   : > { %v277_v14 = vmul.f32 %v275_v12, %v275_v12  ;;  %v278_v15 = vmul.f32 %v276_v13, %v276_v13 }
  0x9d   : > { %v279_v16 = vadd.f32 %v278_v15, %v277_v14 }
  0x9f   : > { %280 = vadd.xlane.f32.xlu0 %v279_v16 }
  0xa5   : > { %v320_v17 = vpop.f32.mrf.mxu0 }
  0xa6   : > { %v344_v18 = vpop.f32.mrf.mxu1  ;;  %v347_v19 = vperm.slane %v320_v17, 0  ;;  %v354_v21 = vperm.slane %v320_v17, 1 }
  0xa7   : > { %v363_v20 = vperm.slane %v344_v18, 0  ;;  %v370_v22 = vperm.slane %v344_v18, 1 }
  0xa8   : > { %352 = vperm.xlu1 %554, %v347_v19  }
  0xa9   : > { %368 = vperm.xlu2 %555, %v363_v20  }
  0xb0   : > { %359 = vperm.xlu1 %554, %v354_v21  }
  0xb1   : > { %375 = vperm.xlu2 %555, %v370_v22  }
 0x103   : > { %v369_v31 = vpop.permute.xlu2 %368 }
 0x10b   : > { %v376_v40 = vpop.permute.xlu2 %375 }
 0x112   : > { %v281_v23 = vpop.xlane.xlu0 %280 }
 0x113   : > { %v282_v24 = vmul.f32 0.00390625, %v281_v23 }
 0x115   : > { %v283_v25 = vadd.f32 1e-05, %v282_v24 }
 0x117   : > { %557 = vrsqrt.f32 %v283_v25  ;;  %vm290_vm2 = vweird.f32 %v283_v25 }
 0x11a   : > { %v353_v28 = vpop.permute.xlu1 %352 }
 0x11d   : > { %v558_v26 = vpop.eup %557 }
 0x11e   : > { %v285_v27 = vmul.f32 %v558_v26, %v283_v25  ;;  %vm291_vm1 = vweird.f32 %v558_v26 }
 0x11f   : > { %vm292_vm3 = vmor %vm290_vm2, %vm291_vm1 }
 0x120   : > { %v286_v29 = vmul.f32 %v558_v26, %v285_v27 }
 0x122   : > { %v287_v30 = vmul.f32 0.5, %v286_v29  ;;  %v360_v35 = vpop.permute.xlu1 %359 }
 0x124   : > { %v288_v32 = vsub.f32 1.5, %v287_v30 }
 0x126   : > { %v289_v33 = vmul.f32 %v558_v26, %v288_v32 }
 0x128   : > { %v293_v34 = vsel %vm292_vm3, %v558_v26, %v289_v33 }
 0x129   : > { %v361_v36 = vmul.f32 %v353_v28, %v293_v34  ;;  %v362_v37 = vmul.f32 %v360_v35, %v293_v34 }
 0x12b   : > { %v377_v38 = vmul.f32 %v361_v36, %v274_v11  ;;  %v378_v39 = vmul.f32 %v362_v37, %v274_v11  ;;  %v381_v41 = vmul.f32 %v361_v36, %v713_v2  ;;  %v382_v43 = vmul.f32 %v362_v37, %v715_v3 }
 0x12d   : > { %v379_v42 = vsub.f32 %v369_v31, %v377_v38  ;;  %v380_v44 = vsub.f32 %v376_v40, %v378_v39 }
 0x12f   : > { %v383_v45 = vadd.f32 %v381_v41, %v379_v42  ;;  %v384_v46 = vadd.f32 %v382_v43, %v380_v44 }
 0x131   : > { %385 = vst [vmem:[%s260_s10] sm:$0xff] %v383_v45 }
 0x132   : > { %386 = vst [vmem:[%s260_s10 + $0x8] sm:$0xff] %v384_v46 }
 0x133   : > { %586 = shalt.err (!%p583_p7)
}
 0x134   : > { %s623_s8 = smov 128   ;;  %s624_s28 = smov 512  }
 0x135   : > { %s625_s29 = smov 8  }
 0x136   : > { %512 = dma.vmem_to_hbm [thread:$0]  (%p690_p6), %s400_s11, 256, %s402_s19, %s388_s9, %s623_s8, %s624_s28, %s625_s29  }
 0x137 PF: > { %p518_p9 = scmp.ge.s32.totalorder %s621_s18, 2  ;;  %s416_s30 = sand.u32 1, %s609_s15  }
 0x138   : > { %s417_s5 = scalar_lea.sflag [#allocation4], %s416_s30 }
 0x139   : > { %p515_p10 = pnand %p518_p9, %p694_p8 }
 0x13b   : > { %p516_p11 = pneg %p515_p10 }
 0x13d   : > { %604 = dma.done.wait (%p516_p11), %s417_s5, 256  }
 0x13e   : > { %606 = vsyncadd (%p516_p11), %s417_s5, 4294967040  ;;  %p14_p12 = scmp.ge.s32.totalorder %s676_s21, 6   ;;  %s774_s15 = smov %s613_s16 }
 0x13f   : > { %s775_s16 = smov %s617_s17  ;;  %s776_s17 = smov %s688_s24 }
 0x140   : > { %s777_s18 = smov %s676_s21  ;;  %16 = sbr.rel (!%p14_p12) target bundleno = 3 (0x3), region = 120 }
 0x145   :  { %423 = vsyncpa [#allocation4], 1 }
 0x146   :  { %425 = vsyncpa [#allocation4 + $0x1], 1 }

</bundles_post_ra>
